<compile_context>
chip_gen: v7x
topology: tpu7x:2x2x1
jax: 0.10.0
libtpu: 0.0.40
codegen_flags: <defaults>
</compile_context>

<pallas_src>
import functools

import jax
import jax.numpy as jnp
import numpy as np
from jax.experimental import pallas as pl
from jax.experimental.pallas import tpu as pltpu


def _round_up(x, m):
    return ((x + m - 1) // m) * m


# ----------------------------------------------------------------------------
# VMEM planning (generation-aware: v7x has 64 MiB / TC, v5e/v6e 128 MiB).
# ----------------------------------------------------------------------------
def _conv_vmem_plan():
    phys = 64 << 20                      # conservative default: assume v7x
    try:
        phys = int(pltpu.get_tpu_info().vmem_capacity_bytes)
    except Exception:
        pass
    vmem_limit = min(max(phys - (16 << 20), 32 << 20), 96 << 20)
    block_budget = vmem_limit // 2       # 2x-buffered in/out blocks + temps <= half
    return block_budget, vmem_limit


def _pick_block_reviews(num_reviews, review_length, word_vec_dim, cout, K,
                        in_esize, out_esize, budget_bytes):
    """Largest T (reviews per grid step) that fits the VMEM budget, multiple of 8,
    with at least 2 grid steps so the parallel axis spans both v7x TensorCores."""
    if num_reviews < 16:
        return num_reviews               # full-dim block (legal for any size)
    in_b = review_length * word_vec_dim * in_esize            # x block (per review)
    out_b = cout * out_esize                                   # pooled block
    im2col = review_length * K * word_vec_dim * in_esize       # in-kernel LHS temp
    conv_b = review_length * cout * 4                          # f32 conv accumulator
    per_review = 2 * in_b + 2 * out_b + im2col + conv_b
    t = budget_bytes // max(per_review, 1)
    t = min(t, -(-num_reviews // 2))     # >= 2 grid steps
    t = max(8, (t // 8) * 8)             # multiple of 8 (sublane alignment)
    return int(t)


# ----------------------------------------------------------------------------
# Kernel 1: fused (user+item) Conv1d("same", odd K) + bias + ReLU + MaxPool(L).
# One grid step = a block of T reviews.  The whole conv is ONE (T*L, K*Cin) x
# (K*Cin, Cp) MXU matmul (im2col) with f32 accumulation; Cp = 2*conv_kernel_num
# (padded to 128 lanes only when 2*Ck > 128).
# ----------------------------------------------------------------------------
def _conv_relu_maxpool_kernel(x_ref, w_ref, b_ref, o_ref, *, K, pad):
    T, L, Cin = x_ref.shape              # static block shape
    Cp = w_ref.shape[1]
    M = T * L

    x2 = x_ref[...].reshape(M, Cin)      # reviews stacked on the matmul M axis
    # position of each row inside its review (narrow (M, 1) iota; broadcasts below)
    l_idx = jax.lax.broadcasted_iota(jnp.int32, (T, L, 1), 1).reshape(M, 1)

    cols = []
    for k in range(K):                   # static unroll: build im2col LHS
        d = k - pad                      # tap reads x[l + d]; zero outside [0, L)
        if d == 0:
            cols.append(x2)
        else:
            xs = jnp.roll(x2, shift=-d, axis=0)
            valid = jnp.logical_and(l_idx + d >= 0, l_idx + d < L)
            cols.append(jnp.where(valid, xs, jnp.zeros_like(xs)))
    lhs = jnp.concatenate(cols, axis=1)                               # (M, K*Cin)

    acc = jnp.dot(lhs, w_ref[...], preferred_element_type=jnp.float32)  # one MXU pass
    acc = jnp.maximum(acc + b_ref[...].astype(jnp.float32), 0.0)        # bias + ReLU
    pooled = jnp.max(acc.reshape(T, L, Cp), axis=1)                     # MaxPool2d((1, L))
    o_ref[...] = pooled.astype(o_ref.dtype)                             # (T, Cp)


def conv_relu_maxpool_fused(x_nlc, w_im2col, b_1p, *, K, block_reviews,
                            vmem_limit, out_dtype):
    NB, L, Cin = x_nlc.shape
    Cp = w_im2col.shape[1]
    assert K % 2 == 1, "MaxPool2d((1, review_length)) implies odd conv_length"
    pad = (K - 1) // 2
    T = block_reviews
    kernel = functools.partial(_conv_relu_maxpool_kernel, K=K, pad=pad)
    return pl.pallas_call(
        kernel,
        out_shape=jax.ShapeDtypeStruct((NB, Cp), out_dtype),
        grid=(pl.cdiv(NB, T),),
        in_specs=[
            pl.BlockSpec((T, L, Cin), lambda n: (n, 0, 0)),
            pl.BlockSpec((K * Cin, Cp), lambda n: (0, 0)),
            pl.BlockSpec((1, Cp), lambda n: (0, 0)),
        ],
        out_specs=pl.BlockSpec((T, Cp), lambda n: (n, 0)),
        compiler_params=pltpu.CompilerParams(
            dimension_semantics=("parallel",),
            vmem_limit_bytes=vmem_limit),
    )(x_nlc, w_im2col, b_1p)


# ----------------------------------------------------------------------------
# Kernel 2: linear_u + linear_i (ReLU) + FactorizationMachine head, fused.
# concat([u, i]) is folded into per-branch matmuls (mathematically identical).
# Gridded over B (parallel, >=2 steps when B > 8 -> both v7x TensorCores).
# ----------------------------------------------------------------------------
def _head_kernel(uf_ref, if_ref, wu_ref, bu_ref, wi_ref, bi_ref,
                 vu_ref, vi_ref, vu2_ref, vi2_ref, fwu_ref, fwi_ref, fb_ref, o_ref):
    u = jnp.maximum(
        jnp.dot(uf_ref[...], wu_ref[...], preferred_element_type=jnp.float32)
        + bu_ref[...], 0.0)                                        # (Bt, Lf)
    it = jnp.maximum(
        jnp.dot(if_ref[...], wi_ref[...], preferred_element_type=jnp.float32)
        + bi_ref[...], 0.0)                                        # (Bt, Lf)

    # FM linear term: VPU multiply + lane reduce; bias is an SMEM scalar.
    lin = (jnp.sum(u * fwu_ref[...] + it * fwi_ref[...], axis=1, keepdims=True)
           + fb_ref[0, 0])                                         # (Bt, 1)

    # FM pairwise term in f32 (tiny matmuls; v^2 precomputed in the wrapper).
    zv = (jnp.dot(u, vu_ref[...], preferred_element_type=jnp.float32)
          + jnp.dot(it, vi_ref[...], preferred_element_type=jnp.float32))
    z2v2 = (jnp.dot(u * u, vu2_ref[...], preferred_element_type=jnp.float32)
            + jnp.dot(it * it, vi2_ref[...], preferred_element_type=jnp.float32))
    pair = 0.5 * jnp.sum(zv * zv - z2v2, axis=1, keepdims=True)    # (Bt, 1)

    o_ref[...] = jnp.broadcast_to(lin + pair, o_ref.shape)         # lane-dense store


def head(u_feat, i_feat, params, *, compute_dtype):
    B, F = u_feat.shape
    Lf = params["wu"].shape[1]
    cd = compute_dtype

    wu = params["wu"].astype(cd)
    wi = params["wi"].astype(cd)
    # pre-split FM params per branch; v^2 hoisted here (grid-invariant, f32 accurate)
    v_u = params["fm_v"][:Lf]                        # (Lf, fm_k) f32
    v_i = params["fm_v"][Lf:]
    v_u2 = v_u * v_u
    v_i2 = v_i * v_i
    fw_u = params["fm_w"][:Lf].reshape(1, Lf)        # f32 (VPU linear term)
    fw_i = params["fm_w"][Lf:].reshape(1, Lf)
    fb = params["fm_b"].reshape(1, 1)
    Kf = v_u.shape[1]

    # B-tile: >=2 grid steps when B > 8 so both v7x TensorCores get work.
    if B <= 8:
        Bt = B
    else:
        Bt = min(128, _round_up((B + 1) // 2, 8))
    OUTW = 128                                       # lane-dense output tile

    def _full(shape):
        return pl.BlockSpec(shape, lambda b: (0, 0))

    out = pl.pallas_call(
        _head_kernel,
        out_shape=jax.ShapeDtypeStruct((B, OUTW), jnp.float32),
        grid=(pl.cdiv(B, Bt),),
        in_specs=[
            pl.BlockSpec((Bt, F), lambda b: (b, 0)),
            pl.BlockSpec((Bt, F), lambda b: (b, 0)),
            _full((F, Lf)), _full((1, Lf)),
            _full((F, Lf)), _full((1, Lf)),
            _full((Lf, Kf)), _full((Lf, Kf)),
            _full((Lf, Kf)), _full((Lf, Kf)),
            _full((1, Lf)), _full((1, Lf)),
            pl.BlockSpec(memory_space=pltpu.MemorySpace.SMEM),
        ],
        out_specs=pl.BlockSpec((Bt, OUTW), lambda b: (b, 0)),
        compiler_params=pltpu.CompilerParams(dimension_semantics=("parallel",)),
    )(u_feat, i_feat, wu, params["bu"], wi, params["bi"],
      v_u, v_i, v_u2, v_i2, fw_u, fw_i, fb)
    return out[:, :1]                                # (B, 1)


# ----------------------------------------------------------------------------
# Full forward pass (glue: embedding gather, weight fusion/padding, reshapes).
# ----------------------------------------------------------------------------
def deepconn_forward(params, user_review, item_review, *, conv_length,
                     compute_dtype=jnp.float32):
    # item_review is unused: the reference module re-derives it from user_review.
    del item_review
    B, R, L = user_review.shape
    NB = B * R
    K = conv_length
    assert params["conv_u_w"].shape[0] == K
    user_flat = user_review.reshape(NB, L)

    # single embedding gather -- the item branch consumes the exact same activations;
    # cast AFTER the gather (no full-vocab HBM re-cast per call).
    vec = jnp.take(params["embedding"], user_flat, axis=0).astype(compute_dtype)

    # fuse user + item conv branches along Cout; pad lanes only when 2*Ck > 128.
    Cin = params["conv_u_w"].shape[1]
    Ck = params["conv_u_w"].shape[2]
    Cout2 = 2 * Ck
    Cp = Cout2 if Cout2 <= 128 else _round_up(Cout2, 128)
    w_cat = jnp.concatenate([params["conv_u_w"], params["conv_i_w"]], axis=2)
    b_cat = jnp.concatenate([params["conv_u_b"], params["conv_i_b"]], axis=1)
    if Cp != Cout2:
        # zero weight AND zero bias keep the padded lanes exactly zero after ReLU.
        w_cat = jnp.pad(w_cat, ((0, 0), (0, 0), (0, Cp - Cout2)))
        b_cat = jnp.pad(b_cat, ((0, 0), (0, Cp - Cout2)))
    w_im2col = w_cat.reshape(K * Cin, Cp).astype(compute_dtype)   # im2col weight layout
    b_pad = b_cat                                                  # bias stays f32

    esize = jnp.dtype(compute_dtype).itemsize
    block_budget, vmem_limit = _conv_vmem_plan()
    T = _pick_block_reviews(NB, L, Cin, Cp, K, esize, esize, block_budget)

    pooled = conv_relu_maxpool_fused(
        vec, w_im2col, b_pad, K=K, block_reviews=T, vmem_limit=vmem_limit,
        out_dtype=compute_dtype)                     # (NB, Cp), compute_dtype

    u_feat = pooled[:, :Ck].reshape(B, R * Ck)       # matches torch .reshape(batch, -1)
    i_feat = pooled[:, Ck:Cout2].reshape(B, R * Ck)
    return head(u_feat, i_feat, params, compute_dtype=compute_dtype)


# ----------------------------------------------------------------------------
# Deterministic parameter init (shapes follow the module's __init__).
# ----------------------------------------------------------------------------
def init_params(key, vocab, word_vec_dim, conv_kernel_num, conv_length,
                review_size, latent_factor_num, fm_k):
    ks = jax.random.split(key, 12)
    s = 0.1
    F = conv_kernel_num * review_size
    return dict(
        embedding=jax.random.normal(ks[0], (vocab, word_vec_dim), jnp.float32) * s,
        # PyTorch Conv1d weight is (Cout, Cin, K); kernel wants (K, Cin, Cout).
        conv_u_w=jax.random.normal(ks[1], (conv_length, word_vec_dim, conv_kernel_num), jnp.float32) * s,
        conv_u_b=jax.random.normal(ks[2], (1, conv_kernel_num), jnp.float32) * s,
        conv_i_w=jax.random.normal(ks[3], (conv_length, word_vec_dim, conv_kernel_num), jnp.float32) * s,
        conv_i_b=jax.random.normal(ks[4], (1, conv_kernel_num), jnp.float32) * s,
        wu=jax.random.normal(ks[5], (F, latent_factor_num), jnp.float32) * s,
        bu=jax.random.normal(ks[6], (1, latent_factor_num), jnp.float32) * s,
        wi=jax.random.normal(ks[7], (F, latent_factor_num), jnp.float32) * s,
        bi=jax.random.normal(ks[8], (1, latent_factor_num), jnp.float32) * s,
        fm_v=jax.random.normal(ks[9], (2 * latent_factor_num, fm_k), jnp.float32) * s,
        fm_w=jax.random.normal(ks[10], (2 * latent_factor_num, 1), jnp.float32) * s,
        fm_b=jax.random.normal(ks[11], (1, 1), jnp.float32) * s,
    )


# ----------------------------------------------------------------------------
# Pure-JAX f32 reference (same math) for verification.
# ----------------------------------------------------------------------------
def reference_forward(params, user_review, conv_length):
    B, R, L = user_review.shape
    NB = B * R
    flat = user_review.reshape(NB, L)
    emb = params["embedding"][flat]  # (NB, L, D)

    def branch(x, w, b, wl, bl):
        K = w.shape[0]
        pad = (K - 1) // 2
        xp = jnp.pad(x, ((0, 0), (pad, pad), (0, 0)))
        conv = sum(jnp.einsum("nlc,co->nlo", xp[:, k:k + L, :], w[k]) for k in range(K)) + b
        pooled = jnp.maximum(conv, 0.0).max(axis=1)  # (NB, Cout)
        feat = pooled.reshape(B, -1)
        return jnp.maximum(feat @ wl + bl, 0.0)

    u = branch(emb, params["conv_u_w"], params["conv_u_b"], params["wu"], params["bu"])
    i = branch(emb, params["conv_i_w"], params["conv_i_b"], params["wi"], params["bi"])
    z = jnp.concatenate([u, i], axis=1)
    lin = z @ params["fm_w"] + params["fm_b"]
    zv = z @ params["fm_v"]
    z2v2 = (z * z) @ (params["fm_v"] ** 2)
    return lin + 0.5 * jnp.sum(zv * zv - z2v2, axis=1, keepdims=True)


if __name__ == "__main__":
    # Small but representative shapes.
    B, review_size, review_length = 2, 4, 16
    word_vec_dim, conv_length, conv_kernel_num = 32, 3, 16
    latent_factor_num, fm_k, vocab = 8, 4, 64

    key = jax.random.PRNGKey(0)
    pkey, dkey = jax.random.split(key)
    params = init_params(pkey, vocab, word_vec_dim, conv_kernel_num, conv_length,
                         review_size, latent_factor_num, fm_k)

    ukey, ikey = jax.random.split(dkey)
    user_review = jax.random.randint(ukey, (B, review_size, review_length), 0, vocab, dtype=jnp.int32)
    item_review = jax.random.randint(ikey, (B, review_size, review_length), 0, vocab, dtype=jnp.int32)

    ref = reference_forward(params, user_review, conv_length)

    # f32 compute path: tight check against the pure-JAX reference.
    fwd_f32 = jax.jit(functools.partial(deepconn_forward, conv_length=conv_length,
                                        compute_dtype=jnp.float32))
    pred32 = jax.block_until_ready(fwd_f32(params, user_review, item_review))
    assert pred32.shape == (B, 1)
    np.testing.assert_allclose(np.asarray(pred32), np.asarray(ref), rtol=1e-3, atol=1e-3)

    # bf16 compute path (works on v5e too: MXU takes bf16, accumulation stays f32).
    fwd_bf16 = jax.jit(functools.partial(deepconn_forward, conv_length=conv_length,
                                         compute_dtype=jnp.bfloat16))
    pred16 = jax.block_until_ready(fwd_bf16(params, user_review, item_review))
    np.testing.assert_allclose(np.asarray(pred16), np.asarray(ref), rtol=5e-2, atol=5e-2)

    print("KERNEL_OK")
</pallas_src>

<mosaic_0001>
module attributes {stable_mosaic.version = 11 : i64} {
  func.func @_conv_relu_maxpool_kernel(%arg0: i32, %arg1: memref<8x16x32xf32, #tpu.memory_space<vmem>>, %arg2: memref<96x32xf32, #tpu.memory_space<vmem>>, %arg3: memref<1x32xf32, #tpu.memory_space<vmem>>, %arg4: memref<8x32xf32, #tpu.memory_space<vmem>>) attributes {dimension_semantics = [#tpu.dimension_semantics<parallel>], iteration_bounds = array<i64: 1>, scalar_prefetch = 0 : i64, scratch_operands = 0 : i64, tpu.core_type = #tpu.core_type<tc>, window_params = [{transform_indices = @transform_0, window_bounds = array<i64: 8, 16, 32>}, {pipeline_mode = #tpu.pipeline_mode<synchronous>, transform_indices = @transform_1, window_bounds = array<i64: 96, 32>}, {pipeline_mode = #tpu.pipeline_mode<synchronous>, transform_indices = @transform_2, window_bounds = array<i64: 1, 32>}, {transform_indices = @transform_3, window_bounds = array<i64: 8, 32>}]} {
    %c0 = arith.constant 0 : index
    %c0_0 = arith.constant 0 : index
    %c0_1 = arith.constant 0 : index
    %0 = vector.load %arg1[%c0, %c0_0, %c0_1] : memref<8x16x32xf32, #tpu.memory_space<vmem>>, vector<8x16x32xf32>
    %1 = vector.shape_cast %0 : vector<8x16x32xf32> to vector<128x32xf32>
    %2 = tpu.iota {dimensions = array<i32: 1>} : vector<8x16x1xi32>
    %3 = vector.shape_cast %2 : vector<8x16x1xi32> to vector<128x1xi32>
    %4 = vector.extract_strided_slice %1 {offsets = [127, 0], sizes = [1, 32], strides = [1, 1]} : vector<128x32xf32> to vector<1x32xf32>
    %5 = vector.extract_strided_slice %1 {offsets = [0, 0], sizes = [127, 32], strides = [1, 1]} : vector<128x32xf32> to vector<127x32xf32>
    %6 = tpu.concatenate %4, %5 in 0 : vector<1x32xf32>, vector<127x32xf32> -> vector<128x32xf32>
    %c-1_i32 = arith.constant -1 : i32
    %7 = vector.broadcast %c-1_i32 : i32 to vector<128x1xi32>
    %8 = arith.addi %3, %7 : vector<128x1xi32>
    %c0_i32 = arith.constant 0 : i32
    %9 = vector.broadcast %c0_i32 : i32 to vector<128x1xi32>
    %10 = arith.cmpi sge, %8, %9 : vector<128x1xi32>
    %c-1_i32_2 = arith.constant -1 : i32
    %11 = vector.broadcast %c-1_i32_2 : i32 to vector<128x1xi32>
    %12 = arith.addi %3, %11 : vector<128x1xi32>
    %c16_i32 = arith.constant 16 : i32
    %13 = vector.broadcast %c16_i32 : i32 to vector<128x1xi32>
    %14 = arith.cmpi slt, %12, %13 : vector<128x1xi32>
    %15 = arith.andi %10, %14 : vector<128x1xi1>
    %cst = arith.constant 0.000000e+00 : f32
    %16 = vector.broadcast %cst : f32 to vector<128x32xf32>
    %17 = vector.shape_cast %15 : vector<128x1xi1> to vector<128x1xi1>
    %18 = vector.broadcast %17 : vector<128x1xi1> to vector<128x32xi1>
    %19 = arith.select %18, %6, %16 : vector<128x32xi1>, vector<128x32xf32>
    %20 = vector.extract_strided_slice %1 {offsets = [1, 0], sizes = [127, 32], strides = [1, 1]} : vector<128x32xf32> to vector<127x32xf32>
    %21 = vector.extract_strided_slice %1 {offsets = [0, 0], sizes = [1, 32], strides = [1, 1]} : vector<128x32xf32> to vector<1x32xf32>
    %22 = tpu.concatenate %20, %21 in 0 : vector<127x32xf32>, vector<1x32xf32> -> vector<128x32xf32>
    %c1_i32 = arith.constant 1 : i32
    %23 = vector.broadcast %c1_i32 : i32 to vector<128x1xi32>
    %24 = arith.addi %3, %23 : vector<128x1xi32>
    %c0_i32_3 = arith.constant 0 : i32
    %25 = vector.broadcast %c0_i32_3 : i32 to vector<128x1xi32>
    %26 = arith.cmpi sge, %24, %25 : vector<128x1xi32>
    %c1_i32_4 = arith.constant 1 : i32
    %27 = vector.broadcast %c1_i32_4 : i32 to vector<128x1xi32>
    %28 = arith.addi %3, %27 : vector<128x1xi32>
    %c16_i32_5 = arith.constant 16 : i32
    %29 = vector.broadcast %c16_i32_5 : i32 to vector<128x1xi32>
    %30 = arith.cmpi slt, %28, %29 : vector<128x1xi32>
    %31 = arith.andi %26, %30 : vector<128x1xi1>
    %cst_6 = arith.constant 0.000000e+00 : f32
    %32 = vector.broadcast %cst_6 : f32 to vector<128x32xf32>
    %33 = vector.shape_cast %31 : vector<128x1xi1> to vector<128x1xi1>
    %34 = vector.broadcast %33 : vector<128x1xi1> to vector<128x32xi1>
    %35 = arith.select %34, %22, %32 : vector<128x32xi1>, vector<128x32xf32>
    %36 = tpu.concatenate %19, %1, %35 in 1 : vector<128x32xf32>, vector<128x32xf32>, vector<128x32xf32> -> vector<128x96xf32>
    %c0_7 = arith.constant 0 : index
    %c0_8 = arith.constant 0 : index
    %37 = vector.load %arg2[%c0_7, %c0_8] : memref<96x32xf32, #tpu.memory_space<vmem>>, vector<96x32xf32>
    %cst_9 = arith.constant dense<0.000000e+00> : vector<128x32xf32>
    %38 = tpu.matmul %36, %37, %cst_9 {dimension_numbers = #tpu.dot_dimension_numbers<[1], [0], [0], [1], [0, 0, 1, 1], [], []>} : vector<128x96xf32>, vector<96x32xf32>, vector<128x32xf32> -> vector<128x32xf32>
    %c0_10 = arith.constant 0 : index
    %c0_11 = arith.constant 0 : index
    %39 = vector.load %arg3[%c0_10, %c0_11] : memref<1x32xf32, #tpu.memory_space<vmem>>, vector<1x32xf32>
    %40 = vector.broadcast %39 : vector<1x32xf32> to vector<128x32xf32>
    %41 = arith.addf %38, %40 : vector<128x32xf32>
    %cst_12 = arith.constant 0.000000e+00 : f32
    %42 = vector.broadcast %cst_12 : f32 to vector<128x32xf32>
    %43 = arith.maximumf %41, %42 : vector<128x32xf32>
    %44 = vector.shape_cast %43 : vector<128x32xf32> to vector<8x16x32xf32>
    %cst_13 = arith.constant dense<0xFF800000> : vector<8x32xf32>
    %45 = vector.multi_reduction <maximumf>, %44, %cst_13 [1] : vector<8x16x32xf32> to vector<8x32xf32>
    %c0_14 = arith.constant 0 : index
    %c0_15 = arith.constant 0 : index
    %46 = vector.load %arg4[%c0_14, %c0_15] : memref<8x32xf32, #tpu.memory_space<vmem>>, vector<8x32xf32>
    tpu.vector_store %arg4[%c0_14, %c0_15], %45 {strides = array<i32>} : memref<8x32xf32, #tpu.memory_space<vmem>>, vector<8x32xf32>,
    return
  }
  func.func @transform_0(%arg0: i32) -> (i32, i32, i32) {
    %c0_i32 = arith.constant 0 : i32
    %c0_i32_0 = arith.constant 0 : i32
    %c0_i32_1 = arith.constant 0 : i32
    return %arg0, %c0_i32, %c0_i32_0 : i32, i32, i32
  }
  func.func @transform_1(%arg0: i32) -> (i32, i32) {
    %c0_i32 = arith.constant 0 : i32
    %c0_i32_0 = arith.constant 0 : i32
    %c0_i32_1 = arith.constant 0 : i32
    return %c0_i32, %c0_i32_0 : i32, i32
  }
  func.func @transform_2(%arg0: i32) -> (i32, i32) {
    %c0_i32 = arith.constant 0 : i32
    %c0_i32_0 = arith.constant 0 : i32
    %c0_i32_1 = arith.constant 0 : i32
    return %c0_i32, %c0_i32_0 : i32, i32
  }
  func.func @transform_3(%arg0: i32) -> (i32, i32) {
    %c0_i32 = arith.constant 0 : i32
    %c0_i32_0 = arith.constant 0 : i32
    return %arg0, %c0_i32 : i32, i32
  }
}

module attributes {stable_mosaic.version = 11 : i64} {
  func.func @_head_kernel(%arg0: i32, %arg1: memref<2x64xf32, #tpu.memory_space<vmem>>, %arg2: memref<2x64xf32, #tpu.memory_space<vmem>>, %arg3: memref<64x8xf32, #tpu.memory_space<vmem>>, %arg4: memref<1x8xf32, #tpu.memory_space<vmem>>, %arg5: memref<64x8xf32, #tpu.memory_space<vmem>>, %arg6: memref<1x8xf32, #tpu.memory_space<vmem>>, %arg7: memref<8x4xf32, #tpu.memory_space<vmem>>, %arg8: memref<8x4xf32, #tpu.memory_space<vmem>>, %arg9: memref<8x4xf32, #tpu.memory_space<vmem>>, %arg10: memref<8x4xf32, #tpu.memory_space<vmem>>, %arg11: memref<1x8xf32, #tpu.memory_space<vmem>>, %arg12: memref<1x8xf32, #tpu.memory_space<vmem>>, %arg13: memref<1x1xf32, #tpu.memory_space<smem>>, %arg14: memref<2x128xf32, #tpu.memory_space<vmem>>) attributes {dimension_semantics = [#tpu.dimension_semantics<parallel>], iteration_bounds = array<i64: 1>, scalar_prefetch = 0 : i64, scratch_operands = 0 : i64, tpu.core_type = #tpu.core_type<tc>, window_params = [{transform_indices = @transform_0, window_bounds = array<i64: 2, 64>}, {transform_indices = @transform_1, window_bounds = array<i64: 2, 64>}, {pipeline_mode = #tpu.pipeline_mode<synchronous>, transform_indices = @transform_2, window_bounds = array<i64: 64, 8>}, {pipeline_mode = #tpu.pipeline_mode<synchronous>, transform_indices = @transform_3, window_bounds = array<i64: 1, 8>}, {pipeline_mode = #tpu.pipeline_mode<synchronous>, transform_indices = @transform_4, window_bounds = array<i64: 64, 8>}, {pipeline_mode = #tpu.pipeline_mode<synchronous>, transform_indices = @transform_5, window_bounds = array<i64: 1, 8>}, {pipeline_mode = #tpu.pipeline_mode<synchronous>, transform_indices = @transform_6, window_bounds = array<i64: 8, 4>}, {pipeline_mode = #tpu.pipeline_mode<synchronous>, transform_indices = @transform_7, window_bounds = array<i64: 8, 4>}, {pipeline_mode = #tpu.pipeline_mode<synchronous>, transform_indices = @transform_8, window_bounds = array<i64: 8, 4>}, {pipeline_mode = #tpu.pipeline_mode<synchronous>, transform_indices = @transform_9, window_bounds = array<i64: 8, 4>}, {pipeline_mode = #tpu.pipeline_mode<synchronous>, transform_indices = @transform_10, window_bounds = array<i64: 1, 8>}, {pipeline_mode = #tpu.pipeline_mode<synchronous>, transform_indices = @transform_11, window_bounds = array<i64: 1, 8>}, {transform_indices = @transform_12, window_bounds = array<i64: 1, 1>}, {transform_indices = @transform_13, window_bounds = array<i64: 2, 128>}]} {
    %c0 = arith.constant 0 : index
    %c0_0 = arith.constant 0 : index
    %0 = vector.load %arg1[%c0, %c0_0] : memref<2x64xf32, #tpu.memory_space<vmem>>, vector<2x64xf32>
    %c0_1 = arith.constant 0 : index
    %c0_2 = arith.constant 0 : index
    %1 = vector.load %arg3[%c0_1, %c0_2] : memref<64x8xf32, #tpu.memory_space<vmem>>, vector<64x8xf32>
    %cst = arith.constant dense<0.000000e+00> : vector<2x8xf32>
    %2 = tpu.matmul %0, %1, %cst {dimension_numbers = #tpu.dot_dimension_numbers<[1], [0], [0], [1], [0, 0, 1, 1], [], []>} : vector<2x64xf32>, vector<64x8xf32>, vector<2x8xf32> -> vector<2x8xf32>
    %c0_3 = arith.constant 0 : index
    %c0_4 = arith.constant 0 : index
    %3 = vector.load %arg4[%c0_3, %c0_4] : memref<1x8xf32, #tpu.memory_space<vmem>>, vector<1x8xf32>
    %4 = vector.broadcast %3 : vector<1x8xf32> to vector<2x8xf32>
    %5 = arith.addf %2, %4 : vector<2x8xf32>
    %cst_5 = arith.constant 0.000000e+00 : f32
    %6 = vector.broadcast %cst_5 : f32 to vector<2x8xf32>
    %7 = arith.maximumf %5, %6 : vector<2x8xf32>
    %c0_6 = arith.constant 0 : index
    %c0_7 = arith.constant 0 : index
    %8 = vector.load %arg2[%c0_6, %c0_7] : memref<2x64xf32, #tpu.memory_space<vmem>>, vector<2x64xf32>
    %c0_8 = arith.constant 0 : index
    %c0_9 = arith.constant 0 : index
    %9 = vector.load %arg5[%c0_8, %c0_9] : memref<64x8xf32, #tpu.memory_space<vmem>>, vector<64x8xf32>
    %cst_10 = arith.constant dense<0.000000e+00> : vector<2x8xf32>
    %10 = tpu.matmul %8, %9, %cst_10 {dimension_numbers = #tpu.dot_dimension_numbers<[1], [0], [0], [1], [0, 0, 1, 1], [], []>} : vector<2x64xf32>, vector<64x8xf32>, vector<2x8xf32> -> vector<2x8xf32>
    %c0_11 = arith.constant 0 : index
    %c0_12 = arith.constant 0 : index
    %11 = vector.load %arg6[%c0_11, %c0_12] : memref<1x8xf32, #tpu.memory_space<vmem>>, vector<1x8xf32>
    %12 = vector.broadcast %11 : vector<1x8xf32> to vector<2x8xf32>
    %13 = arith.addf %10, %12 : vector<2x8xf32>
    %cst_13 = arith.constant 0.000000e+00 : f32
    %14 = vector.broadcast %cst_13 : f32 to vector<2x8xf32>
    %15 = arith.maximumf %13, %14 : vector<2x8xf32>
    %c0_14 = arith.constant 0 : index
    %c0_15 = arith.constant 0 : index
    %16 = vector.load %arg11[%c0_14, %c0_15] : memref<1x8xf32, #tpu.memory_space<vmem>>, vector<1x8xf32>
    %17 = vector.broadcast %16 : vector<1x8xf32> to vector<2x8xf32>
    %18 = arith.mulf %7, %17 : vector<2x8xf32>
    %c0_16 = arith.constant 0 : index
    %c0_17 = arith.constant 0 : index
    %19 = vector.load %arg12[%c0_16, %c0_17] : memref<1x8xf32, #tpu.memory_space<vmem>>, vector<1x8xf32>
    %20 = vector.broadcast %19 : vector<1x8xf32> to vector<2x8xf32>
    %21 = arith.mulf %15, %20 : vector<2x8xf32>
    %22 = arith.addf %18, %21 : vector<2x8xf32>
    %cst_18 = arith.constant dense<0.000000e+00> : vector<2xf32>
    %23 = vector.multi_reduction <add>, %22, %cst_18 [1] : vector<2x8xf32> to vector<2xf32>
    %24 = vector.shape_cast %23 : vector<2xf32> to vector<2x1xf32>
    %c0_19 = arith.constant 0 : index
    %c0_20 = arith.constant 0 : index
    %25 = memref.load %arg13[%c0_19, %c0_20] : memref<1x1xf32, #tpu.memory_space<smem>>
    %26 = vector.broadcast %25 : f32 to vector<2x1xf32>
    %27 = arith.addf %24, %26 : vector<2x1xf32>
    %c0_21 = arith.constant 0 : index
    %c0_22 = arith.constant 0 : index
    %28 = vector.load %arg7[%c0_21, %c0_22] : memref<8x4xf32, #tpu.memory_space<vmem>>, vector<8x4xf32>
    %cst_23 = arith.constant dense<0.000000e+00> : vector<2x4xf32>
    %29 = tpu.matmul %7, %28, %cst_23 {dimension_numbers = #tpu.dot_dimension_numbers<[1], [0], [0], [1], [0, 0, 1, 1], [], []>} : vector<2x8xf32>, vector<8x4xf32>, vector<2x4xf32> -> vector<2x4xf32>
    %c0_24 = arith.constant 0 : index
    %c0_25 = arith.constant 0 : index
    %30 = vector.load %arg8[%c0_24, %c0_25] : memref<8x4xf32, #tpu.memory_space<vmem>>, vector<8x4xf32>
    %cst_26 = arith.constant dense<0.000000e+00> : vector<2x4xf32>
    %31 = tpu.matmul %15, %30, %cst_26 {dimension_numbers = #tpu.dot_dimension_numbers<[1], [0], [0], [1], [0, 0, 1, 1], [], []>} : vector<2x8xf32>, vector<8x4xf32>, vector<2x4xf32> -> vector<2x4xf32>
    %32 = arith.addf %29, %31 : vector<2x4xf32>
    %33 = arith.mulf %7, %7 : vector<2x8xf32>
    %c0_27 = arith.constant 0 : index
    %c0_28 = arith.constant 0 : index
    %34 = vector.load %arg9[%c0_27, %c0_28] : memref<8x4xf32, #tpu.memory_space<vmem>>, vector<8x4xf32>
    %cst_29 = arith.constant dense<0.000000e+00> : vector<2x4xf32>
    %35 = tpu.matmul %33, %34, %cst_29 {dimension_numbers = #tpu.dot_dimension_numbers<[1], [0], [0], [1], [0, 0, 1, 1], [], []>} : vector<2x8xf32>, vector<8x4xf32>, vector<2x4xf32> -> vector<2x4xf32>
    %36 = arith.mulf %15, %15 : vector<2x8xf32>
    %c0_30 = arith.constant 0 : index
    %c0_31 = arith.constant 0 : index
    %37 = vector.load %arg10[%c0_30, %c0_31] : memref<8x4xf32, #tpu.memory_space<vmem>>, vector<8x4xf32>
    %cst_32 = arith.constant dense<0.000000e+00> : vector<2x4xf32>
    %38 = tpu.matmul %36, %37, %cst_32 {dimension_numbers = #tpu.dot_dimension_numbers<[1], [0], [0], [1], [0, 0, 1, 1], [], []>} : vector<2x8xf32>, vector<8x4xf32>, vector<2x4xf32> -> vector<2x4xf32>
    %39 = arith.addf %35, %38 : vector<2x4xf32>
    %40 = arith.mulf %32, %32 : vector<2x4xf32>
    %41 = arith.subf %40, %39 : vector<2x4xf32>
    %cst_33 = arith.constant dense<0.000000e+00> : vector<2xf32>
    %42 = vector.multi_reduction <add>, %41, %cst_33 [1] : vector<2x4xf32> to vector<2xf32>
    %43 = vector.shape_cast %42 : vector<2xf32> to vector<2x1xf32>
    %cst_34 = arith.constant 5.000000e-01 : f32
    %44 = vector.broadcast %cst_34 : f32 to vector<2x1xf32>
    %45 = arith.mulf %44, %43 : vector<2x1xf32>
    %46 = arith.addf %27, %45 : vector<2x1xf32>
    %47 = vector.shape_cast %46 : vector<2x1xf32> to vector<2x1xf32>
    %48 = vector.broadcast %47 : vector<2x1xf32> to vector<2x128xf32>
    %c0_35 = arith.constant 0 : index
    %c0_36 = arith.constant 0 : index
    %49 = vector.load %arg14[%c0_35, %c0_36] : memref<2x128xf32, #tpu.memory_space<vmem>>, vector<2x128xf32>
    tpu.vector_store %arg14[%c0_35, %c0_36], %48 {strides = array<i32>} : memref<2x128xf32, #tpu.memory_space<vmem>>, vector<2x128xf32>,
    return
  }
  func.func @transform_0(%arg0: i32) -> (i32, i32) {
    %c0_i32 = arith.constant 0 : i32
    %c0_i32_0 = arith.constant 0 : i32
    return %arg0, %c0_i32 : i32, i32
  }
  func.func @transform_1(%arg0: i32) -> (i32, i32) {
    %c0_i32 = arith.constant 0 : i32
    %c0_i32_0 = arith.constant 0 : i32
    return %arg0, %c0_i32 : i32, i32
  }
  func.func @transform_2(%arg0: i32) -> (i32, i32) {
    %c0_i32 = arith.constant 0 : i32
    %c0_i32_0 = arith.constant 0 : i32
    %c0_i32_1 = arith.constant 0 : i32
    return %c0_i32, %c0_i32_0 : i32, i32
  }
  func.func @transform_3(%arg0: i32) -> (i32, i32) {
    %c0_i32 = arith.constant 0 : i32
    %c0_i32_0 = arith.constant 0 : i32
    %c0_i32_1 = arith.constant 0 : i32
    return %c0_i32, %c0_i32_0 : i32, i32
  }
  func.func @transform_4(%arg0: i32) -> (i32, i32) {
    %c0_i32 = arith.constant 0 : i32
    %c0_i32_0 = arith.constant 0 : i32
    %c0_i32_1 = arith.constant 0 : i32
    return %c0_i32, %c0_i32_0 : i32, i32
  }
  func.func @transform_5(%arg0: i32) -> (i32, i32) {
    %c0_i32 = arith.constant 0 : i32
    %c0_i32_0 = arith.constant 0 : i32
    %c0_i32_1 = arith.constant 0 : i32
    return %c0_i32, %c0_i32_0 : i32, i32
  }
  func.func @transform_6(%arg0: i32) -> (i32, i32) {
    %c0_i32 = arith.constant 0 : i32
    %c0_i32_0 = arith.constant 0 : i32
    %c0_i32_1 = arith.constant 0 : i32
    return %c0_i32, %c0_i32_0 : i32, i32
  }
  func.func @transform_7(%arg0: i32) -> (i32, i32) {
    %c0_i32 = arith.constant 0 : i32
    %c0_i32_0 = arith.constant 0 : i32
    %c0_i32_1 = arith.constant 0 : i32
    return %c0_i32, %c0_i32_0 : i32, i32
  }
  func.func @transform_8(%arg0: i32) -> (i32, i32) {
    %c0_i32 = arith.constant 0 : i32
    %c0_i32_0 = arith.constant 0 : i32
    %c0_i32_1 = arith.constant 0 : i32
    return %c0_i32, %c0_i32_0 : i32, i32
  }
  func.func @transform_9(%arg0: i32) -> (i32, i32) {
    %c0_i32 = arith.constant 0 : i32
    %c0_i32_0 = arith.constant 0 : i32
    %c0_i32_1 = arith.constant 0 : i32
    return %c0_i32, %c0_i32_0 : i32, i32
  }
  func.func @transform_10(%arg0: i32) -> (i32, i32) {
    %c0_i32 = arith.constant 0 : i32
    %c0_i32_0 = arith.constant 0 : i32
    %c0_i32_1 = arith.constant 0 : i32
    return %c0_i32, %c0_i32_0 : i32, i32
  }
  func.func @transform_11(%arg0: i32) -> (i32, i32) {
    %c0_i32 = arith.constant 0 : i32
    %c0_i32_0 = arith.constant 0 : i32
    %c0_i32_1 = arith.constant 0 : i32
    return %c0_i32, %c0_i32_0 : i32, i32
  }
  func.func @transform_12(%arg0: i32) -> (i32, i32) {
    %c0_i32 = arith.constant 0 : i32
    %c0_i32_0 = arith.constant 0 : i32
    %c0_i32_1 = arith.constant 0 : i32
    return %c0_i32, %c0_i32_0 : i32, i32
  }
  func.func @transform_13(%arg0: i32) -> (i32, i32) {
    %c0_i32 = arith.constant 0 : i32
    %c0_i32_0 = arith.constant 0 : i32
    return %arg0, %c0_i32 : i32, i32
  }
}

</mosaic_0001>

<bundles_post_ra>
// kernel: mul.2
= control target key start
LH: loop header
LB: loop body
LE: loop exit
PB: predicated region body
PF: predicated region fallthrough
CT: control target
= control target key end

     0   :  { %s34_s0 = inlined_call_operand.vmem [shape: f32[8,4], index: 0, kind: input, shape index: {}, may-alias: {0,1}]   ;;  %s35_s1 = inlined_call_operand.vmem [shape: f32[8,4], index: 1, kind: input, shape index: {}, may-alias: {0,1}]   ;;  %s36_s2 = inlined_call_operand.vmem [shape: f32[8,4], index: 2, kind: output, shape index: {}]  }
   0x1   :  { %v3_v0 = vld [vmem:[%s34_s0] sm:$0xff] }
   0x2   :  { %v4_v1 = vld [vmem:[%s35_s1] sm:$0xff] }
   0x3   :  { %v7_v2 = vmul.f32 %v4_v1, %v3_v0 }
   0x5   :  { %9 = vst [vmem:[%s36_s2] sm:$0xff] %v7_v2 }

// kernel: deepconn_forward.2
= control target key start
LH: loop header
LB: loop body
LE: loop exit
PB: predicated region body
PF: predicated region fallthrough
CT: control target
= control target key end

     0   :  { %v30_v0 = vlaneseq  ;;  %s811_s18 = smov 32   ;;  %vm127_vm0 = vcmask 1046528   ;;  %s812_s21 = smov 64   ;;  %vm51_vm2 = vcmask 1040384   ;;  %vm317_vm4 = vcmask 261120   ;;  %s1254_s0 = inlined_call_operand.vmem [shape: f32[8,16,32], index: 0, kind: input, shape index: {}]   ;;  %s1255_s1 = inlined_call_operand.vmem [shape: f32[96,32], index: 1, kind: input, shape index: {}]   ;;  %s1256_s2 = inlined_call_operand.vmem [shape: f32[1,32], index: 2, kind: input, shape index: {}]   ;;  %s1257_s3 = inlined_call_operand.vmem [shape: f32[8,32], index: 3, kind: output, shape index: {}]  }
   0x1   :  { %v836_v1 = vld [vmem:[%s1254_s0 + $0x40] sm:$0xff]  ;;  %v846_v3 = vld [vmem:[%s1254_s0 + $0x8] sm:$0xff]  ;;  %v856_v5 = vld [vmem:[%s1254_s0 + $0x10] sm:$0xff]  ;;  %vm334_vm5 = vcmask 523264   ;;  %vm370_vm6 = vcmask 785408   ;;  %vm660_vm7 = vcmask 1041409  }
   0x2   :  { %v841_v2 = vld [vmem:[%s1254_s0] sm:$0xff]  ;;  %221 = vrot.lane.b32.xlu1 %v836_v1, %s811_s18  ;;  %v129_v6 = vrot.slane %v846_v3, 1  ;;  %v131_v7 = vrot.slane %v856_v5, 1  ;;  %v31_v8 = vshrl.u32 %v30_v0, 7  ;;  %v877_v14 = vld [vmem:[%s1254_s0 + $0x18] sm:$0xff]  ;;  %v882_v15 = vld [vmem:[%s1254_s0 + $0x48] sm:$0xff] }
   0x3   :  { %205 = vrot.lane.b32.xlu0 %v841_v2, %s811_s18  ;;  %v128_v4 = vrot.slane %v841_v2, 1  ;;  %v869_v11 = vld [vmem:[%s1254_s0 + $0x20] sm:$0xff]  ;;  %v891_v17 = vld [vmem:[%s1254_s0 + $0x50] sm:$0xff]  ;;  %v896_v18 = vld [vmem:[%s1254_s0 + $0x38] sm:$0xff]  ;;  %v133_v21 = vrot.slane %v877_v14, 1  ;;  %v67_v25 = vrot.slane %v836_v1, 7 }
   0x4   :  { %v32_v10 = vadd.s32 8, %v31_v8  ;;  %v132_v12 = vsel %vm127_vm0, %v129_v6, %v131_v7  ;;  %v135_v16 = vrot.slane %v869_v11, 1  ;;  %v351_v19 = vld [vmem:[%s1255_s1] sm:$0xff]  ;;  %v352_v22 = vld [vmem:[%s1255_s1 + $0x8] sm:$0xff]  ;;  %v353_v23 = vld [vmem:[%s1255_s1 + $0x10] sm:$0xff]  ;;  %v143_v26 = vrot.slane %v836_v1, 1 }
   0x5   :  { %v130_v9 = vsel %vm127_vm0, %v128_v4, %v129_v6  ;;  %v354_v24 = vld [vmem:[%s1255_s1 + $0x18] sm:$0xff]  ;;  %v145_v27 = vrot.slane %v882_v15, 1  ;;  %v65_v28 = vrot.slane %v896_v18, 7  ;;  %v52_v30 = vrot.slane %v841_v2, 7  ;;  %v936_v36 = vld [vmem:[%s1254_s0 + $0x28] sm:$0xff]  ;;  %v355_v43 = vld [vmem:[%s1255_s1 + $0x20] sm:$0xff] }
   0x6   :  { %269 = vrot.lane.b32.xlu1 %v130_v9, %s812_s21  ;;  %v872_v13 = vadd.s32 1, %v32_v10  ;;  %v921_v29 = vld [vmem:[%s1254_s0 + $0x78] sm:$0xff]  ;;  %v53_v31 = vrot.slane %v846_v3, 7  ;;  %v147_v32 = vrot.slane %v891_v17, 1  ;;  %v55_v34 = vrot.slane %v856_v5, 7  ;;  %v356_v44 = vld [vmem:[%s1255_s1 + $0x28] sm:$0xff] }
   0x7   :  { %207 = vrot.lane.b32.xlu0 %v846_v3, %s811_s18  ;;  %v34_v33 = vrot.slane %v921_v29, 7  ;;  %v136_v35 = vsel %vm127_vm0, %v133_v21, %v135_v16  ;;  %v773_v37 = vpack.c.bf16 %v352_v22, %v351_v19  ;;  %v777_v38 = vpack.c.bf16 %v354_v24, %v353_v23  ;;  %v944_v42 = vld [vmem:[%s1254_s0 + $0x58] sm:$0xff]  ;;  %v357_v57 = vld [vmem:[%s1255_s1 + $0x30] sm:$0xff]  ;;  %v26_v22 = vld [vmem:[%s1254_s0 + $0x60] sm:$0xff] }
   0x8   :  { %vm182_vm1 = vcmp.lt.s32.totalorder %v872_v13, 16  ;;  %v57_v39 = vrot.slane %v877_v14, 7  ;;  %v69_v40 = vrot.slane %v882_v15, 7  ;;  %v134_v41 = vsel %vm127_vm0, %v131_v7, %v133_v21  ;;  %v358_v58 = vld [vmem:[%s1255_s1 + $0x38] sm:$0xff]  ;;  %v20_v19 = vld [vmem:[%s1254_s0 + $0x30] sm:$0xff] }
   0x9   :  { %v190_v20 = vsel %vm182_vm1, %v132_v12, 0.0  ;;  %v952_v45 = vadd.s32 4294967295, %v31_v8  ;;  %v146_v46 = vsel %vm127_vm0, %v143_v26, %v145_v27  ;;  %v61_v47 = vrot.slane %v936_v36, 7  ;;  %774 = vmatprep.subr.bf16.mxu0 %v773_v37  ;;  %797 = vmatprep.subr.bf16.mxu1 %v773_v37  ;;  %v359_v12 = vld [vmem:[%s1255_s1 + $0x40] sm:$0xff]  ;;  %v361_v23 = vld [vmem:[%s1255_s1 + $0x50] sm:$0xff]  ;;  %v362_v24 = vld [vmem:[%s1255_s1 + $0x58] sm:$0xff] }
   0xa   :  { %271 = vrot.lane.b32.xlu1 %v190_v20, %s812_s21  ;;  %v73_v48 = vrot.slane %v944_v42, 7  ;;  %v68_v49 = vsel %vm51_vm2, %v65_v28, %v67_v25  ;;  %v192_v50 = vsel %vm182_vm1, %v136_v35, 0.0  ;;  %v148_v51 = vsel %vm127_vm0, %v145_v27, %v147_v32  ;;  %776 = vmatpush3.bf16.msra.mxu0 %v773_v37 }
   0xb   :  { %209 = vrot.lane.b32.xlu0 %v856_v5, %s811_s18  ;;  %vm101_vm3 = vcmp.ge.s32.totalorder %v952_v45, 0  ;;  %v98_v52 = vsel %vm51_vm2, %v34_v33, %v52_v30  ;;  %778 = vmatprep.subr.bf16.mxu0 %v777_v38  ;;  %v781_v53 = vpack.c.bf16 %v356_v44, %v355_v43  ;;  %v983_v56 = vsel %vm51_vm2, %v52_v30, %v53_v31  ;;  %v27_v30 = vld [vmem:[%s1254_s0 + $0x68] sm:$0xff] }
   0xc   :  { %v976_v54 = vsel %vm101_vm3, %v68_v49, 0.0  ;;  %v980_v55 = vsel %vm101_vm3, %v98_v52, 0.0  ;;  %803 = vmatpush3.bf16.msra.mxu1 %v773_v37  ;;  %v56_v59 = vsel %vm51_vm2, %v53_v31, %v55_v34  ;;  %v993_v60 = vsel %vm51_vm2, %v55_v34, %v57_v39 }
   0xd   :  { %v996_v61 = vsel %vm51_vm2, %v67_v25, %v69_v40  ;;  %v59_v62 = vrot.slane %v869_v11, 7  ;;  %798 = vmatprep.subr.bf16.mxu1 %v777_v38  ;;  %v1002_v63 = vsel %vm101_vm3, %v56_v59, 0.0  ;;  %v71_v0 = vrot.slane %v891_v17, 7 }
   0xe   :  { %223 = vrot.lane.b32.xlu1 %v882_v15, %s811_s18  ;;  %v198_v3 = vsel %vm182_vm1, %v148_v51, 0.0  ;;  %780 = vmatpush3.bf16.msra.mxu0 %v777_v38  ;;  %v785_v7 = vpack.c.bf16 %v358_v58, %v357_v57  ;;  %v137_v21 = vrot.slane %v936_v36, 1  ;;  %v63_v25 = vrot.slane %v20_v19, 7 }
   0xf   :  { %211 = vrot.lane.b32.xlu0 %v877_v14, %s811_s18  ;;  %v60_v5 = vsel %vm51_vm2, %v57_v39, %v59_v62  ;;  %v1011_v6 = vsel %vm51_vm2, %v59_v62, %v61_v47  ;;  %782 = vmatprep.subr.bf16.mxu0 %v781_v53  ;;  %v72_v9 = vsel %vm51_vm2, %v69_v40, %v71_v0  ;;  %v360_v14 = vld [vmem:[%s1255_s1 + $0x48] sm:$0xff]  ;;  %v139_v27 = vrot.slane %v20_v19, 1 }
  0x10   :  { %v1016_v8 = vsel %vm101_vm3, %v60_v5, 0.0  ;;  %v1022_v10 = vsel %vm51_vm2, %v71_v0, %v73_v48  ;;  %804 = vmatpush3.bf16.msra.mxu1 %v777_v38  ;;  %v1032_v15 = vsel %vm101_vm3, %v72_v9, 0.0  ;;  %v789_v20 = vpack.c.bf16 %v360_v14, %v359_v12 }
  0x11   :  { %799 = vmatprep.subr.bf16.mxu1 %v781_v53  ;;  %v75_v31 = vrot.slane %v26_v22, 7  ;;  %v149_v34 = vrot.slane %v944_v42, 1  ;;  %v77_v35 = vrot.slane %v27_v30, 7  ;;  %v64_v37 = vsel %vm51_vm2, %v61_v47, %v63_v25 }
  0x12   :  { %285 = vrot.lane.b32.xlu1 %v146_v46, %s812_s21  ;;  %784 = vmatpush3.bf16.msra.mxu0 %v781_v53  ;;  %v151_v38 = vrot.slane %v26_v22, 1  ;;  %v793_v39 = vpack.c.bf16 %v362_v24, %v361_v23  ;;  %v1063_v40 = vsel %vm101_vm3, %v64_v37, 0.0  ;;  %v138_v43 = vsel %vm127_vm0, %v135_v16, %v137_v21 }
  0x13   :  { %273 = vrot.lane.b32.xlu0 %v134_v41, %s812_s21  ;;  %786 = vmatprep.subr.bf16.mxu0 %v785_v7  ;;  %v76_v41 = vsel %vm51_vm2, %v73_v48, %v75_v31  ;;  %v140_v46 = vsel %vm127_vm0, %v137_v21, %v139_v27  ;;  %v1087_v16 = vsel %vm51_vm2, %v75_v31, %v77_v35  ;;  %v153_v49 = vrot.slane %v27_v30, 1 }
  0x14   :  { %805 = vmatpush3.bf16.msra.mxu1 %v781_v53  ;;  %v1073_v44 = vsel %vm101_vm3, %v76_v41, 0.0  ;;  %v152_v47 = vsel %vm127_vm0, %v149_v34, %v151_v38  ;;  %v157_v1 = vrot.slane %v921_v29, 1  ;;  %vm662_vm8 = vcmask 1042434  }
  0x15   :  { %800 = vmatprep.subr.bf16.mxu1 %v785_v7  ;;  %v154_v58 = vsel %vm127_vm0, %v151_v38, %v153_v49  ;;  %vm664_vm9 = vcmask 1043459   ;;  %vm666_vm10 = vcmask 1044484   ;;  %vm668_vm11 = vcmask 1045509  }
  0x16   :  { %287 = vrot.lane.b32.xlu1 %v198_v3, %s812_s21  ;;  %788 = vmatpush3.bf16.msra.mxu0 %v785_v7  ;;  %vm670_vm12 = vcmask 1046534   ;;  %vm672_vm13 = vcmask 1047559  }
  0x17   :  { %275 = vrot.lane.b32.xlu0 %v192_v50, %s812_s21  ;;  %790 = vmatprep.subr.bf16.mxu0 %v789_v20 }
  0x18   :  { %806 = vmatpush3.bf16.msra.mxu1 %v785_v7 }
  0x19   :  { %801 = vmatprep.subr.bf16.mxu1 %v789_v20 }
  0x1a   :  { %225 = vrot.lane.b32.xlu1 %v891_v17, %s811_s18  ;;  %792 = vmatpush3.bf16.msra.mxu0 %v789_v20  ;;  %v200_v17 = vsel %vm182_vm1, %v152_v47, 0.0 }
  0x1b   :  { %213 = vrot.lane.b32.xlu0 %v869_v11, %s811_s18  ;;  %v150_v11 = vsel %vm127_vm0, %v147_v32, %v149_v34  ;;  %794 = vmatprep.subr.bf16.mxu0 %v793_v39  ;;  %v1102_v32 = vld [vmem:[%s1254_s0 + $0x70] sm:$0xff] }
  0x1c   :  { %807 = vmatpush3.bf16.msra.mxu1 %v789_v20  ;;  %v79_v48 = vrot.slane %v1102_v32, 7  ;;  %v155_v51 = vrot.slane %v1102_v32, 1 }
  0x1d   :  { %802 = vmatprep.subr.bf16.mxu1 %v793_v39 }
  0x1e   :  { %227 = vrot.lane.b32.xlu1 %v944_v42, %s811_s18  ;;  %796 = vmatpush3.bf16.msra.mxu0 %v793_v39  ;;  %v141_v42 = vrot.slane %v896_v18, 1  ;;  %v80_v50 = vsel %vm51_vm2, %v77_v35, %v79_v48  ;;  %v158_v62 = vsel %vm127_vm0, %v155_v51, %v157_v1 }
  0x1f   :  { %215 = vrot.lane.b32.xlu0 %v936_v36, %s811_s18  ;;  %v1078_v36 = vsel %vm51_vm2, %v63_v25, %v65_v28  ;;  %v194_v28 = vsel %vm182_vm1, %v140_v46, 0.0  ;;  %v1115_v52 = vsel %vm101_vm3, %v80_v50, 0.0 }
  0x20   :  { %808 = vmatpush3.bf16.msra.mxu1 %v793_v39  ;;  %v142_v53 = vsel %vm127_vm0, %v139_v27, %v141_v42  ;;  %v144_v57 = vsel %vm127_vm0, %v141_v42, %v143_v26  ;;  %v176_v26 = vsel %vm127_vm0, %v157_v1, %v128_v4 }
  0x21   :  { %v196_v59 = vsel %vm182_vm1, %v144_v57, 0.0  ;;  %v204_v0 = vsel %vm182_vm1, %v176_v26, 0.0 }
  0x22   :  { %289 = vrot.lane.b32.xlu1 %v150_v11, %s812_s21 }
  0x23   :  { %277 = vrot.lane.b32.xlu0 %v138_v43, %s812_s21 }
  0x26   :  { %291 = vrot.lane.b32.xlu1 %v200_v17, %s812_s21 }
  0x27   :  { %279 = vrot.lane.b32.xlu0 %v194_v28, %s812_s21 }
  0x2a   :  { %229 = vrot.lane.b32.xlu1 %v26_v22, %s811_s18 }
  0x2b   :  { %217 = vrot.lane.b32.xlu0 %v20_v19, %s811_s18 }
  0x2e   :  { %231 = vrot.lane.b32.xlu1 %v27_v30, %s811_s18 }
  0x2f   :  { %219 = vrot.lane.b32.xlu0 %v896_v18, %s811_s18  ;;  %v156_v18 = vsel %vm127_vm0, %v153_v49, %v155_v51 }
  0x30   :  { %v202_v45 = vsel %vm182_vm1, %v156_v18, 0.0 }
  0x32   :  { %293 = vrot.lane.b32.xlu1 %v154_v58, %s812_s21 }
  0x33   :  { %281 = vrot.lane.b32.xlu0 %v142_v53, %s812_s21 }
  0x36   :  { %295 = vrot.lane.b32.xlu1 %v202_v45, %s812_s21 }
  0x37   :  { %283 = vrot.lane.b32.xlu0 %v196_v59, %s812_s21 }
  0x3a   :  { %235 = vrot.lane.b32.xlu1 %v921_v29, %s811_s18  ;;  %v1216_v29 = vld [vmem:[%s1256_s2] ss:$0 sm:$0xff] }
  0x3b   :  { %233 = vrot.lane.b32.xlu0 %v1102_v32, %s811_s18 }
  0x3e   :  { %299 = vrot.lane.b32.xlu1 %v204_v0, %s812_s21 }
  0x3f   :  { %297 = vrot.lane.b32.xlu0 %v158_v62, %s812_s21 }
  0x74   :  { %v222_v3 = vpop.permute.xlu1 %221 }
  0x75   :  { %v206_v5 = vpop.permute.xlu0 %205  ;;  %v326_v24 = vsel %vm317_vm4, %v976_v54, %v222_v3 }
  0x76   :  { %v318_v2 = vsel %vm317_vm4, %v980_v55, %v206_v5 }
  0x78   :  { %v270_v7 = vpop.permute.xlu1 %269 }
  0x79   :  { %v208_v4 = vpop.permute.xlu0 %207  ;;  %v335_v9 = vsel %vm334_vm5, %v318_v2, %v270_v7 }
  0x7a   :  { %749 = vmatprep.mubr.msk.f32.mxu0 %vm370_vm6, %v335_v9  ;;  %v319_v12 = vsel %vm317_vm4, %v983_v56, %v208_v4 }
  0x7c   :  { %v272_v14 = vpop.permute.xlu1 %271 }
  0x7d   :  { %v210_v13 = vpop.permute.xlu0 %209  ;;  %v336_v19 = vsel %vm334_vm5, %v319_v12, %v272_v14 }
  0x7e   :  { %750 = vmatmul.mubr.msk.f32.vlgmr.msra.gmra.mrb[0].mxu0 %vm370_vm6, %v336_v19  ;;  %v320_v55 = vsel %vm317_vm4, %v1002_v63, %v210_v13 }
  0x80   :  { %v224_v21 = vpop.permute.xlu1 %223 }
  0x81   :  { %v212_v20 = vpop.permute.xlu0 %211  ;;  %v327_v63 = vsel %vm317_vm4, %v996_v61, %v224_v21 }
  0x82   :  { %v321_v27 = vsel %vm317_vm4, %v993_v60, %v212_v20 }
  0x84   :  { %v286_v25 = vpop.permute.xlu1 %285 }
  0x85   :  { %v274_v22 = vpop.permute.xlu0 %273  ;;  %v343_v56 = vsel %vm334_vm5, %v326_v24, %v286_v25 }
  0x86   :  { %v337_v23 = vsel %vm334_vm5, %v320_v55, %v274_v22  ;;  %761 = vmatprep.mubr.msk.f32.mxu1 %vm370_vm6, %v343_v56 }
  0x87   :  { %752 = vmatprep.mubr.msk.f32.mxu0 %vm370_vm6, %v337_v23 }
  0x88   :  { %v288_v34 = vpop.permute.xlu1 %287 }
  0x89   :  { %v276_v30 = vpop.permute.xlu0 %275  ;;  %v344_v54 = vsel %vm334_vm5, %v327_v63, %v288_v34 }
  0x8a   :  { %v338_v31 = vsel %vm334_vm5, %v321_v27, %v276_v30  ;;  %762 = vmatmul.mubr.msk.f32.vlgmr.msra.gmra.mrb[0].mxu1 %vm370_vm6, %v344_v54 }
  0x8b   :  { %753 = vmatmul.mubr.msk.f32.gmra.mrb[2].mxu0 %vm370_vm6, %v338_v31 }
  0x8c   :  { %v226_v37 = vpop.permute.xlu1 %225 }
  0x8d   :  { %v214_v35 = vpop.permute.xlu0 %213  ;;  %v328_v61 = vsel %vm317_vm4, %v1032_v15, %v226_v37 }
  0x8e   :  { %v322_v60 = vsel %vm317_vm4, %v1016_v8, %v214_v35 }
  0x90   :  { %v228_v39 = vpop.permute.xlu1 %227 }
  0x91   :  { %v216_v38 = vpop.permute.xlu0 %215  ;;  %v329_v8 = vsel %vm317_vm4, %v1022_v10, %v228_v39 }
  0x92   :  { %v323_v47 = vsel %vm317_vm4, %v1011_v6, %v216_v38 }
  0x94   :  { %v290_v46 = vpop.permute.xlu1 %289 }
  0x95   :  { %v278_v41 = vpop.permute.xlu0 %277  ;;  %v345_v11 = vsel %vm334_vm5, %v328_v61, %v290_v46 }
  0x96   :  { %v339_v43 = vsel %vm334_vm5, %v322_v60, %v278_v41  ;;  %764 = vmatprep.mubr.msk.f32.mxu1 %vm370_vm6, %v345_v11 }
  0x97   :  { %755 = vmatprep.mubr.msk.f32.mxu0 %vm370_vm6, %v339_v43 }
  0x98   :  { %v292_v42 = vpop.permute.xlu1 %291 }
  0x99   :  { %v280_v28 = vpop.permute.xlu0 %279  ;;  %v346_v15 = vsel %vm334_vm5, %v329_v8, %v292_v42 }
  0x9a   :  { %v340_v17 = vsel %vm334_vm5, %v323_v47, %v280_v28  ;;  %765 = vmatmul.mubr.msk.f32.gmra.mrb[2].mxu1 %vm370_vm6, %v346_v15 }
  0x9b   :  { %756 = vmatmul.mubr.msk.f32.gmra.mrb[4].mxu0 %vm370_vm6, %v340_v17 }
  0x9c   :  { %v230_v50 = vpop.permute.xlu1 %229 }
  0x9d   :  { %v218_v49 = vpop.permute.xlu0 %217  ;;  %v330_v10 = vsel %vm317_vm4, %v1073_v44, %v230_v50 }
  0x9e   :  { %v324_v6 = vsel %vm317_vm4, %v1063_v40, %v218_v49 }
  0xa0   :  { %v232_v53 = vpop.permute.xlu1 %231 }
  0xa1   :  { %v220_v51 = vpop.permute.xlu0 %219  ;;  %v331_v40 = vsel %vm317_vm4, %v1087_v16, %v232_v53 }
  0xa2   :  { %v325_v45 = vsel %vm317_vm4, %v1078_v36, %v220_v51  ;;  %v81_v36 = vsel %vm51_vm2, %v79_v48, %v34_v33 }
  0xa4   :  { %v294_v18 = vpop.permute.xlu1 %293 }
  0xa5   :  { %v282_v57 = vpop.permute.xlu0 %281  ;;  %v347_v59 = vsel %vm334_vm5, %v330_v10, %v294_v18 }
  0xa6   :  { %v341_v58 = vsel %vm334_vm5, %v324_v6, %v282_v57  ;;  %767 = vmatprep.mubr.msk.f32.mxu1 %vm370_vm6, %v347_v59 }
  0xa7   :  { %758 = vmatprep.mubr.msk.f32.mxu0 %vm370_vm6, %v341_v58 }
  0xa8   :  { %v296_v62 = vpop.permute.xlu1 %295 }
  0xa9   :  { %v284_v1 = vpop.permute.xlu0 %283  ;;  %v348_v44 = vsel %vm334_vm5, %v331_v40, %v296_v62 }
  0xaa   :  { %v342_v26 = vsel %vm334_vm5, %v325_v45, %v284_v1  ;;  %768 = vmatmul.mubr.msk.f32.gmra.mrb[4].mxu1 %vm370_vm6, %v348_v44 }
  0xab   :  { %759 = vmatmul.mubr.msk.f32.gmra.mrb[6].mxu0 %vm370_vm6, %v342_v26 }
  0xac   :  { %v236_v3 = vpop.permute.xlu1 %235 }
  0xad   :  { %v234_v0 = vpop.permute.xlu0 %233  ;;  %v333_v4 = vsel %vm317_vm4, %v81_v36, %v236_v3 }
  0xae   :  { %v332_v5 = vsel %vm317_vm4, %v1115_v52, %v234_v0 }
  0xb0   :  { %v300_v7 = vpop.permute.xlu1 %299 }
  0xb1   :  { %v298_v2 = vpop.permute.xlu0 %297  ;;  %v350_v9 = vsel %vm334_vm5, %v333_v4, %v300_v7 }
  0xb2   :  { %v349_v16 = vsel %vm334_vm5, %v332_v5, %v298_v2 }
  0xb3   :  { %770 = vmatprep.mubr.msk.f32.mxu1 %vm370_vm6, %v349_v16 }
  0xb4   :  { %771 = vmatmul.mubr.msk.f32.gmra.mrb[6].mxu1 %vm370_vm6, %v350_v9 }
 0x151   :  { %v751_v33 = vpop.f32.mrb[0].mxu0 }
 0x152   :  { %v491_v32 = vadd.f32 %v751_v33, %v1216_v29  ;;  %v485_v48 = vpop.f32.mrb[1].mxu0 }
 0x153   :  { %v486_v52 = vadd.f32 %v1216_v29, %v485_v48 }
 0x154   :  { %v565_v13 = vmax.f32 %v491_v32, 0.0 }
 0x155   :  { %v564_v12 = vmax.f32 %v486_v52, 0.0 }
 0x156   :  { %v581_v14 = vsel %vm317_vm4, %v565_v13, -inf }
 0x157   :  { %v580_v19 = vsel %vm317_vm4, %v564_v12, -inf }
 0x158   :  { %v582_v20 = vmax.f32 %v580_v19, %v581_v14 }
 0x15a   :  { %v583_v21 = vrot.slane %v582_v20, 4 }
 0x15c   :  { %v584_v56 = vmax.f32 %v582_v20, %v583_v21 }
 0x15d   :  { %v763_v24 = vpop.f32.mrb[0].mxu1 }
 0x15e   :  { %v754_v55 = vpop.f32.mrb[2].mxu0  ;;  %v531_v30 = vadd.f32 %v763_v24, %v1216_v29  ;;  %v525_v31 = vpop.f32.mrb[1].mxu1  ;;  %v585_v39 = vrot.slane %v584_v56, 2 }
 0x15f   :  { %v501_v22 = vadd.f32 %v754_v55, %v1216_v29  ;;  %v495_v23 = vpop.f32.mrb[3].mxu0  ;;  %v526_v34 = vadd.f32 %v1216_v29, %v525_v31 }
 0x160   :  { %v496_v25 = vadd.f32 %v1216_v29, %v495_v23  ;;  %v573_v35 = vmax.f32 %v531_v30, 0.0  ;;  %v586_v11 = vmax.f32 %v584_v56, %v585_v39 }
 0x161   :  { %v567_v27 = vmax.f32 %v501_v22, 0.0  ;;  %v572_v38 = vmax.f32 %v526_v34, 0.0 }
 0x162   :  { %v566_v63 = vmax.f32 %v496_v25, 0.0  ;;  %v617_v60 = vsel %vm317_vm4, %v573_v35, -inf  ;;  %v587_v17 = vrot.slane %v586_v11, 1 }
 0x163   :  { %v590_v54 = vsel %vm317_vm4, %v567_v27, -inf  ;;  %v616_v43 = vsel %vm317_vm4, %v572_v38, -inf }
 0x164   :  { %v589_v37 = vsel %vm317_vm4, %v566_v63, -inf  ;;  %v618_v46 = vmax.f32 %v616_v43, %v617_v60  ;;  %v588_v6 = vmax.f32 %v586_v11, %v587_v17 }
 0x165   :  { %v591_v41 = vmax.f32 %v589_v37, %v590_v54 }
 0x166   :  { %v619_v9 = vrot.slane %v618_v46, 4 }
 0x167   :  { %v592_v61 = vrot.slane %v591_v41, 4 }
 0x168   :  { %v620_v22 = vmax.f32 %v618_v46, %v619_v9 }
 0x169   :  { %v593_v47 = vmax.f32 %v591_v41, %v592_v61 }
 0x16a   :  { %v621_v35 = vrot.slane %v620_v22, 2 }
 0x16b   :  { %v594_v28 = vrot.slane %v593_v47, 2 }
 0x16d   :  { %v595_v8 = vmax.f32 %v593_v47, %v594_v28  ;;  %v766_v51 = vpop.f32.mrb[2].mxu1  ;;  %v622_v47 = vmax.f32 %v620_v22, %v621_v35 }
 0x16e   :  { %v757_v42 = vpop.f32.mrb[4].mxu0  ;;  %v541_v10 = vadd.f32 %v766_v51, %v1216_v29  ;;  %v535_v18 = vpop.f32.mrb[3].mxu1 }
 0x16f   :  { %v596_v15 = vrot.slane %v595_v8, 1  ;;  %v511_v49 = vadd.f32 %v757_v42, %v1216_v29  ;;  %v505_v50 = vpop.f32.mrb[5].mxu0  ;;  %v536_v45 = vadd.f32 %v1216_v29, %v535_v18 }
 0x170   :  { %v506_v53 = vadd.f32 %v1216_v29, %v505_v50  ;;  %v575_v40 = vmax.f32 %v541_v10, 0.0 }
 0x171   :  { %v597_v57 = vmax.f32 %v595_v8, %v596_v15  ;;  %v569_v58 = vmax.f32 %v511_v49, 0.0  ;;  %v574_v44 = vmax.f32 %v536_v45, 0.0 }
 0x172   :  { %v568_v59 = vmax.f32 %v506_v53, 0.0  ;;  %v626_v0 = vsel %vm317_vm4, %v575_v40, -inf }
 0x173   :  { %v661_v1 = vsel %vm660_vm7, %v597_v57, %v588_v6  ;;  %v599_v26 = vsel %vm317_vm4, %v569_v58, -inf  ;;  %v625_v36 = vsel %vm317_vm4, %v574_v44, -inf  ;;  %v623_v6 = vrot.slane %v622_v47, 1 }
 0x174   :  { %v598_v62 = vsel %vm317_vm4, %v568_v59, -inf  ;;  %v627_v2 = vmax.f32 %v625_v36, %v626_v0 }
 0x175   :  { %v600_v3 = vmax.f32 %v598_v62, %v599_v26  ;;  %v624_v26 = vmax.f32 %v622_v47, %v623_v6 }
 0x176   :  { %v628_v48 = vrot.slane %v627_v2, 4 }
 0x177   :  { %v601_v5 = vrot.slane %v600_v3, 4 }
 0x178   :  { %v629_v56 = vmax.f32 %v627_v2, %v628_v48 }
 0x179   :  { %v602_v16 = vmax.f32 %v600_v3, %v601_v5 }
 0x17a   :  { %v630_v38 = vrot.slane %v629_v56, 2 }
 0x17b   :  { %v603_v4 = vrot.slane %v602_v16, 2 }
 0x17c   :  { %v631_v17 = vmax.f32 %v629_v56, %v630_v38 }
 0x17d   :  { %v604_v7 = vmax.f32 %v602_v16, %v603_v4  ;;  %v769_v12 = vpop.f32.mrb[4].mxu1 }
 0x17e   :  { %v760_v33 = vpop.f32.mrb[6].mxu0  ;;  %v551_v21 = vadd.f32 %v769_v12, %v1216_v29  ;;  %v545_v55 = vpop.f32.mrb[5].mxu1  ;;  %v632_v58 = vrot.slane %v631_v17, 1 }
 0x17f   :  { %v605_v32 = vrot.slane %v604_v7, 1  ;;  %v521_v52 = vadd.f32 %v760_v33, %v1216_v29  ;;  %v515_v13 = vpop.f32.mrb[7].mxu0  ;;  %v546_v24 = vadd.f32 %v1216_v29, %v545_v55 }
 0x180   :  { %v516_v14 = vadd.f32 %v1216_v29, %v515_v13  ;;  %v577_v30 = vmax.f32 %v551_v21, 0.0  ;;  %v633_v40 = vmax.f32 %v631_v17, %v632_v58 }
 0x181   :  { %v606_v19 = vmax.f32 %v604_v7, %v605_v32  ;;  %v571_v20 = vmax.f32 %v521_v52, 0.0  ;;  %v576_v63 = vmax.f32 %v546_v24, 0.0 }
 0x182   :  { %v570_v23 = vmax.f32 %v516_v14, 0.0  ;;  %v635_v34 = vsel %vm317_vm4, %v577_v30, -inf }
 0x183   :  { %v663_v25 = vsel %vm662_vm8, %v606_v19, %v661_v1  ;;  %v608_v27 = vsel %vm317_vm4, %v571_v20, -inf  ;;  %v634_v37 = vsel %vm317_vm4, %v576_v63, -inf }
 0x184   :  { %v607_v31 = vsel %vm317_vm4, %v570_v23, -inf  ;;  %v636_v60 = vmax.f32 %v634_v37, %v635_v34 }
 0x185   :  { %v609_v54 = vmax.f32 %v607_v31, %v608_v27 }
 0x186   :  { %v637_v61 = vrot.slane %v636_v60, 4 }
 0x187   :  { %v610_v39 = vrot.slane %v609_v54, 4  ;;  %v772_v41 = vpop.f32.mrb[6].mxu1 }
 0x188   :  { %v561_v46 = vadd.f32 %v772_v41, %v1216_v29  ;;  %v555_v11 = vpop.f32.mrb[7].mxu1  ;;  %v638_v42 = vmax.f32 %v636_v60, %v637_v61 }
 0x189   :  { %v611_v43 = vmax.f32 %v609_v54, %v610_v39  ;;  %v556_v28 = vadd.f32 %v1216_v29, %v555_v11 }
 0x18a   :  { %v579_v15 = vmax.f32 %v561_v46, 0.0  ;;  %v639_v51 = vrot.slane %v638_v42, 2 }
 0x18b   :  { %v612_v8 = vrot.slane %v611_v43, 2  ;;  %v578_v49 = vmax.f32 %v556_v28, 0.0 }
 0x18c   :  { %v644_v53 = vsel %vm317_vm4, %v579_v15, -inf  ;;  %v640_v18 = vmax.f32 %v638_v42, %v639_v51 }
 0x18d   :  { %v613_v50 = vmax.f32 %v611_v43, %v612_v8  ;;  %v643_v57 = vsel %vm317_vm4, %v578_v49, -inf }
 0x18e   :  { %v645_v59 = vmax.f32 %v643_v57, %v644_v53  ;;  %v641_v29 = vrot.slane %v640_v18, 1 }
 0x18f   :  { %v614_v10 = vrot.slane %v613_v50, 1 }
 0x190   :  { %v646_v1 = vrot.slane %v645_v59, 4  ;;  %v642_v3 = vmax.f32 %v640_v18, %v641_v29 }
 0x191   :  { %v615_v45 = vmax.f32 %v613_v50, %v614_v10 }
 0x192   :  { %v647_v44 = vmax.f32 %v645_v59, %v646_v1 }
 0x193   :  { %v665_v62 = vsel %vm664_vm9, %v615_v45, %v663_v25 }
 0x194   :  { %v667_v0 = vsel %vm666_vm10, %v624_v26, %v665_v62  ;;  %v648_v5 = vrot.slane %v647_v44, 2 }
 0x195   :  { %v669_v36 = vsel %vm668_vm11, %v633_v40, %v667_v0 }
 0x196   :  { %v671_v2 = vsel %vm670_vm12, %v642_v3, %v669_v36  ;;  %v649_v16 = vmax.f32 %v647_v44, %v648_v5 }
 0x198   :  { %v650_v4 = vrot.slane %v649_v16, 1 }
 0x19a   :  { %v651_v7 = vmax.f32 %v649_v16, %v650_v4 }
 0x19c   :  { %v673_v9 = vsel %vm672_vm13, %v651_v7, %v671_v2 }
 0x19d   :  { %675 = vst.msk [vmem:[%s1257_s3] sm:$0xff] %vm317_vm4, %v673_v9 }

// kernel: deepconn_forward.3
= control target key start
LH: loop header
LB: loop body
LE: loop exit
PB: predicated region body
PF: predicated region fallthrough
CT: control target
= control target key end

     0   :  { %v687_v0 = vmov 0.0|0.0   ;;  %vm688_vm0 = vmmov 0   ;;  %v689_v8 = vmov 0.0   ;;  %vm61_vm1 = vcmask 523264   ;;  %s864_s2 = inlined_call_operand.vmem [shape: f32[64,8], index: 2, kind: input, shape index: {}]   ;;  %s865_s4 = inlined_call_operand.vmem [shape: f32[64,8], index: 4, kind: input, shape index: {}]   ;;  %s866_s0 = inlined_call_operand.vmem [shape: f32[2,64], index: 0, kind: input, shape index: {}]   ;;  %s867_s1 = inlined_call_operand.vmem [shape: f32[2,64], index: 1, kind: input, shape index: {}]   ;;  %s868_s7 = inlined_call_operand.vmem [shape: f32[8,4], index: 7, kind: input, shape index: {}]   ;;  %s869_s9 = inlined_call_operand.vmem [shape: f32[8,4], index: 9, kind: input, shape index: {}]   ;;  %s870_s3 = inlined_call_operand.vmem [shape: f32[1,8], index: 3, kind: input, shape index: {}]   ;;  %s871_s5 = inlined_call_operand.vmem [shape: f32[1,8], index: 5, kind: input, shape index: {}]   ;;  %s872_s10 = inlined_call_operand.vmem [shape: f32[1,8], index: 10, kind: input, shape index: {}]   ;;  %s873_s11 = inlined_call_operand.vmem [shape: f32[1,8], index: 11, kind: input, shape index: {}]   ;;  %s874_s6 = inlined_call_operand.vmem [shape: f32[8,4], index: 6, kind: input, shape index: {}]   ;;  %s875_s8 = inlined_call_operand.vmem [shape: f32[8,4], index: 8, kind: input, shape index: {}]   ;;  %s876_s12 = inlined_call_operand.<no memory space> [shape: f32[1,1], index: 12, kind: input, shape index: {}]   ;;  %s877_s13 = inlined_call_operand.vmem [shape: f32[2,128], index: 13, kind: output, shape index: {}]  }
   0x1   :  { %656 = vmatprep.subr.bf16.mxu0 %v687_v0  ;;  %668 = vmatprep.subr.bf16.mxu1 %v687_v0  ;;  %v46_v1 = vld [vmem:[%s864_s2] sm:$0xff]  ;;  %v47_v2 = vld [vmem:[%s864_s2 + $0x8] sm:$0xff]  ;;  %v48_v6 = vld [vmem:[%s864_s2 + $0x10] sm:$0xff]  ;;  %vm252_vm2 = vcmask 64512   ;;  %vm243_vm3 = vcmask 58368   ;;  %vm551_vm4 = vcmask 25600   ;;  %v248_v58 = vstv %s876_s12 }
   0x2   :  { %v137_v3 = vld [vmem:[%s865_s4] sm:$0xff]  ;;  %v657_v4 = vpack.c.bf16 %v47_v2, %v46_v1  ;;  %v138_v5 = vld [vmem:[%s865_s4 + $0x8] sm:$0xff]  ;;  %v49_v7 = vld [vmem:[%s864_s2 + $0x18] sm:$0xff]  ;;  %614 = vmatprep.mubr.msk.f32.mxu0 %vm688_vm0, %v689_v8  ;;  %633 = vmatprep.mubr.msk.f32.mxu1 %vm688_vm0, %v689_v8 }
   0x3   :  { %v669_v9 = vpack.c.bf16 %v138_v5, %v137_v3  ;;  %v139_v10 = vld [vmem:[%s865_s4 + $0x10] sm:$0xff]  ;;  %v140_v11 = vld [vmem:[%s865_s4 + $0x18] sm:$0xff]  ;;  %v660_v12 = vpack.c.bf16 %v49_v7, %v48_v6  ;;  %v50_v14 = vld [vmem:[%s864_s2 + $0x20] sm:$0xff] }
   0x4   :  { %658 = vmatpush3.bf16.msra.mxu0 %v657_v4  ;;  %v672_v13 = vpack.c.bf16 %v140_v11, %v139_v10  ;;  %v51_v15 = vld [vmem:[%s864_s2 + $0x28] sm:$0xff]  ;;  %v141_v16 = vld [vmem:[%s865_s4 + $0x20] sm:$0xff]  ;;  %v52_v20 = vld [vmem:[%s864_s2 + $0x30] sm:$0xff] }
   0x5   :  { %670 = vmatpush3.bf16.msra.mxu1 %v669_v9  ;;  %659 = vmatprep.subr.bf16.mxu0 %v687_v0  ;;  %v142_v17 = vld [vmem:[%s865_s4 + $0x28] sm:$0xff]  ;;  %v663_v18 = vpack.c.bf16 %v51_v15, %v50_v14  ;;  %v53_v21 = vld [vmem:[%s864_s2 + $0x38] sm:$0xff]  ;;  %v143_v22 = vld [vmem:[%s865_s4 + $0x30] sm:$0xff] }
   0x6   :  { %671 = vmatprep.subr.bf16.mxu1 %v687_v0  ;;  %v675_v19 = vpack.c.bf16 %v142_v17, %v141_v16  ;;  %v144_v23 = vld [vmem:[%s865_s4 + $0x38] sm:$0xff]  ;;  %v666_v24 = vpack.c.bf16 %v53_v21, %v52_v20  ;;  %v45_v26 = vld [vmem:[%s866_s0] sm:$0x3] }
   0x7   :  { %v678_v25 = vpack.c.bf16 %v144_v23, %v143_v22  ;;  %v136_v27 = vld [vmem:[%s867_s1] sm:$0x3] }
   0x8   :  { %661 = vmatpush3.bf16.msra.mxu0 %v660_v12  ;;  %v251_v28 = vld [vmem:[%s868_s7] sm:$0xff] }
   0x9   :  { %673 = vmatpush3.bf16.msra.mxu1 %v672_v13  ;;  %662 = vmatprep.subr.bf16.mxu0 %v687_v0  ;;  %v402_v29 = vld [vmem:[%s869_s9] sm:$0xff] }
   0xa   :  { %674 = vmatprep.subr.bf16.mxu1 %v687_v0  ;;  %v562_v30 = vld [vmem:[%s870_s3] ss:$0 sm:$0xff] }
   0xb   :  { %v564_v31 = vld [vmem:[%s871_s5] ss:$0 sm:$0xff] }
   0xc   :  { %664 = vmatpush3.bf16.msra.mxu0 %v663_v18  ;;  %v566_v38 = vld [vmem:[%s872_s10] ss:$0 sm:$0xff] }
   0xd   :  { %676 = vmatpush3.bf16.msra.mxu1 %v675_v19  ;;  %665 = vmatprep.subr.bf16.mxu0 %v687_v0  ;;  %v567_v40 = vld [vmem:[%s873_s11] ss:$0 sm:$0xff] }
   0xe   :  { %677 = vmatprep.subr.bf16.mxu1 %v687_v0  ;;  %v250_v42 = vld [vmem:[%s874_s6] sm:$0xff] }
   0xf   :  { %v400_v45 = vld [vmem:[%s875_s8] sm:$0xff] }
  0x10   :  { %667 = vmatpush3.bf16.msra.mxu0 %v666_v24 }
  0x11   :  { %679 = vmatpush3.bf16.msra.mxu1 %v678_v25  ;;  %636 = vmatprep.subr.mxu0 %v689_v8 }
  0x12   :  { %646 = vmatprep.subr.mxu1 %v689_v8 }
  0x13   :  { %615 = vmatmul.mubr.msk.f32.vlgmr.msra.gmra.mrb[0].mxu0 %vm61_vm1, %v45_v26 }
  0x14   :  { %634 = vmatmul.mubr.msk.f32.vlgmr.msra.gmra.mrb[0].mxu1 %vm61_vm1, %v136_v27  ;;  %638 = vmatprep.mubr.msk.f32.mxu0 %vm688_vm0, %v689_v8 }
  0x15   :  { %648 = vmatprep.mubr.msk.f32.mxu1 %vm688_vm0, %v689_v8  ;;  %637 = vmatpush3.msra.mxu0 %v251_v28 }
  0x16   :  { %641 = vmatprep.subr.mxu0 %v689_v8  ;;  %647 = vmatpush3.msra.mxu1 %v402_v29 }
  0x17   :  { %651 = vmatprep.subr.mxu1 %v689_v8 }
  0xe6   :  { %v131_v32 = vpop.f32.mrb[0].mxu0 }
  0xe7   :  { %v132_v33 = vadd.f32 %v562_v30, %v131_v32  ;;  %v221_v34 = vpop.f32.mrb[0].mxu1  ;;  %v616_v35 = vpop.f32.mrb[1].mxu0 }
  0xe8   :  { %v222_v36 = vadd.f32 %v564_v31, %v221_v34  ;;  %v635_v37 = vpop.f32.mrb[1].mxu1 }
  0xe9   :  { %v135_v39 = vmax.f32 %v132_v33, 0.0 }
  0xea   :  { %v225_v41 = vmax.f32 %v222_v36, 0.0 }
  0xeb   :  { %v233_v43 = vmul.f32 %v566_v38, %v135_v39  ;;  %v399_v49 = vmul.f32 %v135_v39, %v135_v39 }
  0xec   :  { %v401_v44 = vmul.f32 %v225_v41, %v225_v41  ;;  %639 = vmatmul.mubr.msk.f32.vlgmr.msra.gmra.mrb[2].mxu0 %vm252_vm2, %v225_v41  ;;  %v241_v46 = vmul.f32 %v567_v40, %v225_v41 }
  0xed   :  { %642 = vmatpush3.msra.mxu0 %v250_v42  ;;  %643 = vmatprep.mubr.msk.f32.mxu0 %vm688_vm0, %v689_v8 }
  0xee   :  { %649 = vmatmul.mubr.msk.f32.vlgmr.msra.gmra.mrb[2].mxu1 %vm252_vm2, %v401_v44  ;;  %v242_v47 = vadd.f32 %v241_v46, %v233_v43 }
  0xef   :  { %652 = vmatpush3.msra.mxu1 %v400_v45  ;;  %653 = vmatprep.mubr.msk.f32.mxu1 %vm688_vm0, %v689_v8 }
  0xf0   :  { %v244_v48 = vsel %vm243_vm3, %v242_v47, 0.0 }
  0xf1   :  { %245 = vadd.xlane.f32.xlu0 %v244_v48 }
  0xf4   :  { %644 = vmatmul.mubr.msk.f32.vlgmr.msra.gmra.mrb[2].mxu0 %vm252_vm2, %v135_v39 }
  0xf6   :  { %654 = vmatmul.mubr.msk.f32.vlgmr.msra.gmra.mrb[2].mxu1 %vm252_vm2, %v399_v49 }
 0x17e   :  { %v246_v57 = vpop.xlane.xlu0 %245 }
 0x17f   :  { %v249_v60 = vadd.f32 %v248_v58, %v246_v57 }
 0x1c7   :  { %v395_v50 = vpop.f32.mrb[2].mxu0 }
 0x1c8   :  { %v549_v51 = vmul.f32 %v395_v50, %v395_v50  ;;  %v645_v52 = vpop.f32.mrb[3].mxu0 }
 0x1c9   :  { %v545_v53 = vpop.f32.mrb[2].mxu1 }
 0x1ca   :  { %v550_v54 = vsub.f32 %v549_v51, %v545_v53  ;;  %v655_v55 = vpop.f32.mrb[3].mxu1 }
 0x1cc   :  { %v552_v56 = vsel %vm551_vm4, %v550_v54, 0.0 }
 0x1cd   :  { %553 = vadd.xlane.f32.xlu0 %v552_v56 }
 0x25a   :  { %v554_v59 = vpop.xlane.xlu0 %553 }
 0x25b   :  { %v555_v61 = vmul.f32 0.5, %v554_v59 }
 0x25d   :  { %v556_v62 = vadd.f32 %v555_v61, %v249_v60 }
 0x25f   :  { %557 = vst [vmem:[%s877_s13] sm:$0x3] %v556_v62 }

</bundles_post_ra>
